<compile_context>
chip_gen: v7x
topology: tpu7x:2x2x1
jax: 0.10.0
libtpu: 0.0.40
codegen_flags: <defaults>
</compile_context>

<pallas_src>
import functools

import jax
import jax.numpy as jnp
from jax.experimental import pallas as pl
from jax.experimental.pallas import tpu as pltpu

EPS = 1e-5  # torch nn.LayerNorm default


def _round_up(n, m):
    return ((n + m - 1) // m) * m


def _ln_linear(x_ref, gamma_ref, beta_ref, w_ref, b_ref):
    """Shared LayerNorm -> Linear(dim, dim) body. Returns (x_f32, sublayer_out_f32)."""
    x = x_ref[...].astype(jnp.float32)                       # (tm, D)

    # LayerNorm over the last dim (biased variance, like torch).
    mean = jnp.mean(x, axis=-1, keepdims=True)
    cent = x - mean
    var = jnp.mean(cent * cent, axis=-1, keepdims=True)
    xn = cent * jax.lax.rsqrt(var + EPS)
    y = xn * gamma_ref[...].astype(jnp.float32) + beta_ref[...].astype(jnp.float32)

    # Sublayer: Linear(dim, dim) on the MXU. Cast the activation to W's dtype
    # (bf16 by default) so the MXU runs native bf16; accumulate in f32.
    w = w_ref[...]
    s = jnp.dot(y.astype(w.dtype), w, preferred_element_type=jnp.float32)
    s = s + b_ref[...].astype(jnp.float32)
    return x, s


def _resconn_eval_kernel(x_ref, gamma_ref, beta_ref, w_ref, b_ref, o_ref):
    x, s = _ln_linear(x_ref, gamma_ref, beta_ref, w_ref, b_ref)
    o_ref[...] = (x + s).astype(o_ref.dtype)


def _resconn_train_kernel(x_ref, gamma_ref, beta_ref, w_ref, b_ref, u_ref, o_ref,
                          *, dropout_p):
    x, s = _ln_linear(x_ref, gamma_ref, beta_ref, w_ref, b_ref)
    # Inverted dropout: one VPU compare + select against precomputed uniforms.
    keep = u_ref[...] >= jnp.float32(dropout_p)
    s = jnp.where(keep, s * jnp.float32(1.0 / (1.0 - dropout_p)), jnp.float32(0.0))
    o_ref[...] = (x + s).astype(o_ref.dtype)


def _vmem_limit_bytes(row_tile, D, x_dtype, out_dtype, mxu_dtype, with_dropout):
    b = 0
    b += 2 * row_tile * D * jnp.dtype(x_dtype).itemsize      # x blocks (double buffered)
    b += 2 * row_tile * D * jnp.dtype(out_dtype).itemsize    # out blocks
    b += 2 * D * D * jnp.dtype(mxu_dtype).itemsize           # W (constant index_map)
    b += 2 * 3 * D * 4                                       # gamma, beta, bias
    if with_dropout:
        b += 2 * row_tile * D * 4                            # dropout uniforms
    # 2x headroom for compiler temporaries, capped at v7x physical VMEM (64 MiB).
    return int(min(64 << 20, max(32 << 20, 2 * b)))


def residual_connection(x, gamma, beta, w, b, *, dropout_p=0.1, training=False,
                        rng_key=None, row_tile=256, mxu_dtype=jnp.bfloat16):
    """x: [B, S, D]. Returns x + dropout(linear(layernorm(x))).

    row_tile: rows per grid step. Default 256 (MXU-M aligned for v6e/v7x, a
    multiple of 128 for v5e); large tiles amortize the ~0.35us per-grid-step
    overhead. It is clamped for small inputs and rows are zero-padded to a
    multiple of the tile (padding rows only — LayerNorm stats are per-row, so
    padding never contaminates real rows).
    """
    B, S, D = x.shape
    R = B * S
    x2 = x.reshape(R, D)

    # Tile sizing + row padding (replaces the old hard `assert R % row_tile == 0`).
    row_tile = max(8, min(int(row_tile), _round_up(R, 8)))
    row_tile = _round_up(row_tile, 8)
    R_pad = _round_up(R, row_tile)
    if R_pad != R:
        x2 = jnp.pad(x2, ((0, R_pad - R), (0, 0)))

    gamma2 = gamma.reshape(1, D).astype(jnp.float32)
    beta2 = beta.reshape(1, D).astype(jnp.float32)
    b2 = b.reshape(1, D).astype(jnp.float32)
    w_m = w.astype(mxu_dtype)                     # bf16 weight for the MXU

    grid = (R_pad // row_tile,)
    row_spec = pl.BlockSpec((row_tile, D), lambda i: (i, 0))
    vec_spec = pl.BlockSpec((1, D), lambda i: (0, 0))
    w_spec = pl.BlockSpec((D, D), lambda i: (0, 0))

    apply_dropout = bool(training) and float(dropout_p) > 0.0

    if apply_dropout:
        if rng_key is None:
            rng_key = jax.random.PRNGKey(0)
        u = jax.random.uniform(rng_key, (R_pad, D), dtype=jnp.float32)
        kernel = functools.partial(_resconn_train_kernel, dropout_p=float(dropout_p))
        in_specs = [row_spec, vec_spec, vec_spec, w_spec, vec_spec, row_spec]
        args = (x2, gamma2, beta2, w_m, b2, u)
    else:
        kernel = _resconn_eval_kernel
        in_specs = [row_spec, vec_spec, vec_spec, w_spec, vec_spec]
        args = (x2, gamma2, beta2, w_m, b2)

    out2 = pl.pallas_call(
        kernel,
        out_shape=jax.ShapeDtypeStruct((R_pad, D), x.dtype),
        grid=grid,
        in_specs=in_specs,
        out_specs=row_spec,
        compiler_params=pltpu.CompilerParams(
            # Row tiles are fully independent -> shard across v7x's 2 TCs.
            dimension_semantics=("parallel",),
            vmem_limit_bytes=_vmem_limit_bytes(
                row_tile, D, x2.dtype, x.dtype, mxu_dtype, apply_dropout),
        ),
    )(*args)

    return out2[:R].reshape(B, S, D)


def _reference_eval(x, gamma, beta, w, b, *, mxu_dtype=jnp.bfloat16):
    """Pure-JAX reference for eval mode (dropout = identity), same bf16 matmul."""
    mean = jnp.mean(x, axis=-1, keepdims=True)
    var = jnp.mean((x - mean) ** 2, axis=-1, keepdims=True)
    y = (x - mean) * jax.lax.rsqrt(var + EPS) * gamma + beta
    B, S, D = x.shape
    s = jnp.dot(y.reshape(-1, D).astype(mxu_dtype), w.astype(mxu_dtype),
                preferred_element_type=jnp.float32).reshape(B, S, D) + b
    return x + s


if __name__ == "__main__":
    B, S, D = 2, 8, 32
    # NOTE: D=32 < 128 means lane-masked stores; real transformer dims
    # (512/1024/...) are lane-dense and hit the fast path automatically.
    key = jax.random.PRNGKey(0)
    kx, kw, kb, kd = jax.random.split(key, 4)

    x = jax.random.normal(kx, (B, S, D), dtype=jnp.float32)

    # Deterministic parameter init.
    gamma = jnp.ones((D,), jnp.float32)          # nn.LayerNorm default weight
    beta = jnp.zeros((D,), jnp.float32)          # nn.LayerNorm default bias
    bound = 1.0 / (D ** 0.5)                     # nn.Linear default init range
    w = jax.random.uniform(kw, (D, D), jnp.float32, -bound, bound)
    b = jax.random.uniform(kb, (D,), jnp.float32, -bound, bound)

    dropout_p = 0.1

    # Eval mode (dropout is identity) -> check against reference.
    out_eval = residual_connection(x, gamma, beta, w, b,
                                   dropout_p=dropout_p, training=False)
    jax.block_until_ready(out_eval)
    ref = _reference_eval(x, gamma, beta, w, b)
    assert jnp.allclose(out_eval, ref, atol=1e-3, rtol=1e-3), "mismatch vs reference"

    # Training mode (exercises the fused dropout path).
    out_train = residual_connection(x, gamma, beta, w, b,
                                    dropout_p=dropout_p, training=True, rng_key=kd)
    jax.block_until_ready(out_train)
    assert out_train.shape == x.shape
    assert bool(jnp.all(jnp.isfinite(out_train)))

    # Semantic check: every training element is either the kept (rescaled)
    # sublayer output plus residual, or the bare residual.
    s = out_eval - x                               # un-dropped sublayer output
    d = out_train - x
    kept_ok = jnp.abs(d - s / (1.0 - dropout_p)) < 1e-3
    drop_ok = jnp.abs(d) < 1e-3
    assert bool(jnp.all(kept_ok | drop_ok)), "dropout semantics mismatch"

    print("KERNEL_OK")
</pallas_src>

<mosaic_0001>
module attributes {stable_mosaic.version = 11 : i64} {
  func.func @_resconn_eval_kernel(%arg0: i32, %arg1: memref<16x32xf32, #tpu.memory_space<vmem>>, %arg2: memref<1x32xf32, #tpu.memory_space<vmem>>, %arg3: memref<1x32xf32, #tpu.memory_space<vmem>>, %arg4: memref<32x32xbf16, #tpu.memory_space<vmem>>, %arg5: memref<1x32xf32, #tpu.memory_space<vmem>>, %arg6: memref<16x32xf32, #tpu.memory_space<vmem>>) attributes {dimension_semantics = [#tpu.dimension_semantics<parallel>], iteration_bounds = array<i64: 1>, scalar_prefetch = 0 : i64, scratch_operands = 0 : i64, tpu.core_type = #tpu.core_type<tc>, window_params = [{transform_indices = @transform_0, window_bounds = array<i64: 16, 32>}, {pipeline_mode = #tpu.pipeline_mode<synchronous>, transform_indices = @transform_1, window_bounds = array<i64: 1, 32>}, {pipeline_mode = #tpu.pipeline_mode<synchronous>, transform_indices = @transform_2, window_bounds = array<i64: 1, 32>}, {pipeline_mode = #tpu.pipeline_mode<synchronous>, transform_indices = @transform_3, window_bounds = array<i64: 32, 32>}, {pipeline_mode = #tpu.pipeline_mode<synchronous>, transform_indices = @transform_4, window_bounds = array<i64: 1, 32>}, {transform_indices = @transform_5, window_bounds = array<i64: 16, 32>}]} {
    %c0 = arith.constant 0 : index
    %c0_0 = arith.constant 0 : index
    %0 = vector.load %arg1[%c0, %c0_0] : memref<16x32xf32, #tpu.memory_space<vmem>>, vector<16x32xf32>
    %cst = arith.constant dense<0.000000e+00> : vector<16xf32>
    %1 = vector.multi_reduction <add>, %0, %cst [1] : vector<16x32xf32> to vector<16xf32>
    %2 = vector.shape_cast %1 : vector<16xf32> to vector<16x1xf32>
    %cst_1 = arith.constant 3.200000e+01 : f32
    %3 = vector.broadcast %cst_1 : f32 to vector<16x1xf32>
    %4 = arith.divf %2, %3 : vector<16x1xf32>
    %5 = vector.broadcast %4 : vector<16x1xf32> to vector<16x32xf32>
    %6 = arith.subf %0, %5 : vector<16x32xf32>
    %7 = arith.mulf %6, %6 : vector<16x32xf32>
    %cst_2 = arith.constant dense<0.000000e+00> : vector<16xf32>
    %8 = vector.multi_reduction <add>, %7, %cst_2 [1] : vector<16x32xf32> to vector<16xf32>
    %9 = vector.shape_cast %8 : vector<16xf32> to vector<16x1xf32>
    %cst_3 = arith.constant 3.200000e+01 : f32
    %10 = vector.broadcast %cst_3 : f32 to vector<16x1xf32>
    %11 = arith.divf %9, %10 : vector<16x1xf32>
    %cst_4 = arith.constant 9.99999974E-6 : f32
    %12 = vector.broadcast %cst_4 : f32 to vector<16x1xf32>
    %13 = arith.addf %11, %12 : vector<16x1xf32>
    %14 = math.rsqrt %13 : vector<16x1xf32>
    %15 = vector.broadcast %14 : vector<16x1xf32> to vector<16x32xf32>
    %16 = arith.mulf %6, %15 : vector<16x32xf32>
    %c0_5 = arith.constant 0 : index
    %c0_6 = arith.constant 0 : index
    %17 = vector.load %arg2[%c0_5, %c0_6] : memref<1x32xf32, #tpu.memory_space<vmem>>, vector<1x32xf32>
    %18 = vector.broadcast %17 : vector<1x32xf32> to vector<16x32xf32>
    %19 = arith.mulf %16, %18 : vector<16x32xf32>
    %c0_7 = arith.constant 0 : index
    %c0_8 = arith.constant 0 : index
    %20 = vector.load %arg3[%c0_7, %c0_8] : memref<1x32xf32, #tpu.memory_space<vmem>>, vector<1x32xf32>
    %21 = vector.broadcast %20 : vector<1x32xf32> to vector<16x32xf32>
    %22 = arith.addf %19, %21 : vector<16x32xf32>
    %c0_9 = arith.constant 0 : index
    %c0_10 = arith.constant 0 : index
    %23 = vector.load %arg4[%c0_9, %c0_10] : memref<32x32xbf16, #tpu.memory_space<vmem>>, vector<32x32xbf16>
    %24 = arith.truncf %22 : vector<16x32xf32> to vector<16x32xbf16>
    %cst_11 = arith.constant dense<0.000000e+00> : vector<16x32xf32>
    %25 = tpu.matmul %24, %23, %cst_11 {dimension_numbers = #tpu.dot_dimension_numbers<[1], [0], [0], [1], [0, 0, 1, 1], [], []>} : vector<16x32xbf16>, vector<32x32xbf16>, vector<16x32xf32> -> vector<16x32xf32>
    %c0_12 = arith.constant 0 : index
    %c0_13 = arith.constant 0 : index
    %26 = vector.load %arg5[%c0_12, %c0_13] : memref<1x32xf32, #tpu.memory_space<vmem>>, vector<1x32xf32>
    %27 = vector.broadcast %26 : vector<1x32xf32> to vector<16x32xf32>
    %28 = arith.addf %25, %27 : vector<16x32xf32>
    %29 = arith.addf %0, %28 : vector<16x32xf32>
    %c0_14 = arith.constant 0 : index
    %c0_15 = arith.constant 0 : index
    %30 = vector.load %arg6[%c0_14, %c0_15] : memref<16x32xf32, #tpu.memory_space<vmem>>, vector<16x32xf32>
    tpu.vector_store %arg6[%c0_14, %c0_15], %29 {strides = array<i32>} : memref<16x32xf32, #tpu.memory_space<vmem>>, vector<16x32xf32>,
    return
  }
  func.func @transform_0(%arg0: i32) -> (i32, i32) {
    %c0_i32 = arith.constant 0 : i32
    %c0_i32_0 = arith.constant 0 : i32
    return %arg0, %c0_i32 : i32, i32
  }
  func.func @transform_1(%arg0: i32) -> (i32, i32) {
    %c0_i32 = arith.constant 0 : i32
    %c0_i32_0 = arith.constant 0 : i32
    %c0_i32_1 = arith.constant 0 : i32
    return %c0_i32, %c0_i32_0 : i32, i32
  }
  func.func @transform_2(%arg0: i32) -> (i32, i32) {
    %c0_i32 = arith.constant 0 : i32
    %c0_i32_0 = arith.constant 0 : i32
    %c0_i32_1 = arith.constant 0 : i32
    return %c0_i32, %c0_i32_0 : i32, i32
  }
  func.func @transform_3(%arg0: i32) -> (i32, i32) {
    %c0_i32 = arith.constant 0 : i32
    %c0_i32_0 = arith.constant 0 : i32
    %c0_i32_1 = arith.constant 0 : i32
    return %c0_i32, %c0_i32_0 : i32, i32
  }
  func.func @transform_4(%arg0: i32) -> (i32, i32) {
    %c0_i32 = arith.constant 0 : i32
    %c0_i32_0 = arith.constant 0 : i32
    %c0_i32_1 = arith.constant 0 : i32
    return %c0_i32, %c0_i32_0 : i32, i32
  }
  func.func @transform_5(%arg0: i32) -> (i32, i32) {
    %c0_i32 = arith.constant 0 : i32
    %c0_i32_0 = arith.constant 0 : i32
    return %arg0, %c0_i32 : i32, i32
  }
}

</mosaic_0001>

<bundles_post_ra>
// kernel: tpu_custom_call.1
= control target key start
LH: loop header
LB: loop body
LE: loop exit
PB: predicated region body
PF: predicated region fallthrough
CT: control target
= control target key end

     0   :  { %10 = vsyncpa [#allocation3], 0  ;;  %s389_s0 = inlined_call_operand.hbm [shape: f32[16,32], index: 0, kind: input, shape index: {}]   ;;  %s390_s1 = inlined_call_operand.vmem [shape: f32[1,32], index: 1, kind: input, shape index: {}]   ;;  %s391_s2 = inlined_call_operand.vmem [shape: f32[1,32], index: 2, kind: input, shape index: {}]   ;;  %s392_s3 = inlined_call_operand.hbm [shape: bf16[32,32], index: 3, kind: input, shape index: {}]   ;;  %s393_s4 = inlined_call_operand.vmem [shape: f32[1,32], index: 4, kind: input, shape index: {}]   ;;  %s394_s5 = inlined_call_operand.hbm [shape: f32[16,32], index: 5, kind: output, shape index: {}]  }
   0x1   :  { %11 = vsyncpa [#allocation6], 0 }
   0x2   :  { %12 = vsyncpa [#allocation4], 0  ;;  %s292_s18 = smov [#allocation2]   ;;  %s220_s22 = scalar_lea.hbm %s389_s0, 256 }
   0x3   :  { %s18_s19 = sshll.u32 %s292_s18, 4  ;;  %p221_p0 = scmp.ne.s32.totalorder %s389_s0, %s220_s22  ;;  %s19_s19 = int_to_ptr.vmem [resolvable:$true] %s18_s19 }
   0x4   :  { %p224_p1 = scmp.lt.u32.totalorder %s220_s22, %s389_s0 }
   0x6   :  { %p226_p2 = pnand %p224_p1, %p221_p0 }
   0x8   :  { %229 = shalt.err (!%p226_p2)
}
   0x9   :  { %s230_s27 = scalar_lea.vmem %s19_s19, 256  ;;  %p235_p4 = scmp.lt.s32.totalorder %s19_s19, %s19_s19 }
   0xa   :  { %p231_p3 = scmp.ne.s32.totalorder %s19_s19, %s230_s27  ;;  %p236_p5 = scmp.lt.s32.totalorder %s230_s27, %s230_s27 }
   0xc   :  { %p237_p6 = por %p236_p5, %p235_p4 }
   0xe   :  { %p238_p7 = pnand %p237_p6, %p231_p3 }
  0x10   :  { %241 = shalt.err (!%p238_p7)
}
  0x11   :  { %s293_s28 = smov 128   ;;  %s294_s29 = smov 8  }
  0x12   :  { %24 = dma.hbm_to_vmem [thread:$0]  %s389_s0, 256, %s19_s19, [#allocation3], %s293_s28, %s293_s28, %s294_s29  }
  0x13   :  { %s295_s7 = smov [#allocation5]   ;;  %s242_s11 = scalar_lea.hbm %s392_s3, 256 }
  0x14   :  { %s34_s8 = sshll.u32 %s295_s7, 4  ;;  %p243_p8 = scmp.ne.s32.totalorder %s392_s3, %s242_s11  ;;  %s35_s8 = int_to_ptr.vmem [resolvable:$true] %s34_s8 }
  0x15   :  { %p246_p9 = scmp.lt.u32.totalorder %s242_s11, %s392_s3 }
  0x17   :  { %p248_p10 = pnand %p246_p9, %p243_p8 }
  0x19   :  { %251 = shalt.err (!%p248_p10)
}
  0x1a   :  { %s252_s16 = scalar_lea.vmem %s35_s8, 256  ;;  %p257_p12 = scmp.lt.s32.totalorder %s35_s8, %s35_s8 }
  0x1b   :  { %p253_p11 = scmp.ne.s32.totalorder %s35_s8, %s252_s16  ;;  %p258_p13 = scmp.lt.s32.totalorder %s252_s16, %s252_s16 }
  0x1d   :  { %p259_p0 = por %p258_p13, %p257_p12 }
  0x1f   :  { %p260_p1 = pnand %p259_p0, %p253_p11 }
  0x21   :  { %263 = shalt.err (!%p260_p1)
}
  0x22   :  { %s296_s0 = smov 64   ;;  %s297_s17 = smov 4  }
  0x23   :  { %40 = dma.hbm_to_vmem [thread:$0]  %s392_s3, 256, %s35_s8, [#allocation6], %s296_s0, %s296_s0, %s297_s17  }
  0x24   :  { %286 = dma.done.wait [#allocation3], 256  }
  0x25   :  { %287 = vsyncadd [#allocation3], 4294967040 }
  0x26   :  { %288 = dma.done.wait [#allocation6], 256  }
  0x27   :  { %289 = vsyncadd [#allocation6], 4294967040  ;;  %vm52_vm0 = vcmask 261120   ;;  %v50_v0 = vld [vmem:[#allocation2] sm:$0xff]  ;;  %v51_v1 = vld [vmem:[#allocation2 + $0x8] sm:$0xff]  ;;  %v298_v15 = vmov 0.0  }
  0x28   :  { %v53_v2 = vsel %vm52_vm0, %v50_v0, 0.0  ;;  %v56_v3 = vsel %vm52_vm0, %v51_v1, 0.0  ;;  %v214_v14 = vld [vmem:[#allocation5] sm:$0xff]   ;;  %197 = vmatprep.subr.bf16.mxu0 %v298_v15  ;;  %v215_v16 = vld [vmem:[#allocation5 + $0x8] sm:$0xff]   ;;  %vm299_vm1 = vmmov 0  }
  0x29   :  { %54 = vadd.xlane.f32.xlu0 %v53_v2  ;;  %198 = vmatpush3.bf16.msra.mxu0 %v214_v14  ;;  %v188_v25 = vld [vmem:[%s390_s1] ss:$0 sm:$0xff]  ;;  %s300_s1 = smov [#allocation7]  }
  0x2a   :  { %201 = vmatprep.mubr.msk.bf16.mxu0 %vm299_vm1, %v298_v15  ;;  %199 = vmatprep.subr.bf16.mxu0 %v298_v15  ;;  %v189_v29 = vld [vmem:[%s391_s2] ss:$0 sm:$0xff]  ;;  %s175_s25 = sshll.u32 %s300_s1, 4  ;;  %s176_s25 = int_to_ptr.vmem [resolvable:$true] %s175_s25 }
  0x2b   :  { %v190_v34 = vld [vmem:[%s393_s4] ss:$0 sm:$0xff]  ;;  %s264_s2 = scalar_lea.vmem %s176_s25, 256  ;;  %p269_p3 = scmp.lt.s32.totalorder %s176_s25, %s176_s25 }
  0x2c   :  { %p265_p2 = scmp.ne.s32.totalorder %s176_s25, %s264_s2  ;;  %p270_p4 = scmp.lt.s32.totalorder %s264_s2, %s264_s2 }
  0x2d   :  { %57 = vadd.xlane.f32.xlu0 %v56_v3  ;;  %200 = vmatpush3.bf16.msra.mxu0 %v215_v16 }
  0x2e   :  { %p271_p5 = por %p270_p4, %p269_p3 }
  0x30   :  { %p272_p6 = pnand %p271_p5, %p265_p2 }
  0xb6   :  { %v55_v4 = vpop.xlane.xlu0 %54 }
  0xb7   :  { %v60_v5 = vmul.f32 0.03125, %v55_v4 }
  0xb9   :  { %v62_v6 = vsub.f32 %v50_v0, %v60_v5 }
  0xba   :  { %v58_v7 = vpop.xlane.xlu0 %57 }
  0xbb   :  { %v61_v8 = vmul.f32 0.03125, %v58_v7  ;;  %v64_v9 = vmul.f32 %v62_v6, %v62_v6 }
  0xbd   :  { %v63_v10 = vsub.f32 %v51_v1, %v61_v8  ;;  %v66_v11 = vsel %vm52_vm0, %v64_v9, 0.0 }
  0xbe   :  { %67 = vadd.xlane.f32.xlu1 %v66_v11 }
  0xbf   :  { %v65_v12 = vmul.f32 %v63_v10, %v63_v10 }
  0xc1   :  { %v69_v13 = vsel %vm52_vm0, %v65_v12, 0.0 }
  0xc2   :  { %70 = vadd.xlane.f32.xlu1 %v69_v13 }
 0x14b   :  { %v68_v17 = vpop.xlane.xlu1 %67 }
 0x14c   :  { %v72_v18 = vmul.f32 0.03125, %v68_v17 }
 0x14e   :  { %v74_v19 = vadd.f32 1e-05, %v72_v18 }
 0x14f   :  { %v71_v20 = vpop.xlane.xlu1 %70 }
 0x150   :  { %216 = vrsqrt.f32 %v74_v19  ;;  %v73_v21 = vmul.f32 0.03125, %v71_v20 }
 0x152   :  { %v75_v22 = vadd.f32 1e-05, %v73_v21 }
 0x154   :  { %218 = vrsqrt.f32 %v75_v22 }
 0x15a   :  { %v217_v23 = vpop.eup %216 }
 0x15b   :  { %v78_v24 = vmul.f32 %v217_v23, %v62_v6 }
 0x15d   :  { %v87_v28 = vmul.f32 %v188_v25, %v78_v24 }
 0x15e   :  { %v219_v26 = vpop.eup %218 }
 0x15f   :  { %v79_v27 = vmul.f32 %v219_v26, %v63_v10  ;;  %v96_v31 = vadd.f32 %v189_v29, %v87_v28 }
 0x161   :  { %v88_v30 = vmul.f32 %v188_v25, %v79_v27 }
 0x163   :  { %v97_v32 = vadd.f32 %v189_v29, %v88_v30 }
 0x165   :  { %v102_v33 = vpack.c.bf16 %v97_v32, %v96_v31 }
 0x167   :  { %202 = vmatmul.mubr.msk.bf16.vlgmr.msra.gmra.mrb[0].mxu0 %vm52_vm0, %v102_v33 }
 0x23a   :  { %v159_v35 = vpop.f32.mrb[0].mxu0 }
 0x23b   :  { %v160_v36 = vadd.f32 %v190_v34, %v159_v35  ;;  %v203_v37 = vpop.f32.mrb[1].mxu0 }
 0x23c   :  { %v162_v38 = vpop.f32.mrb[2].mxu0 }
 0x23d   :  { %v166_v39 = vadd.f32 %v160_v36, %v50_v0  ;;  %v163_v40 = vadd.f32 %v190_v34, %v162_v38  ;;  %v204_v41 = vpop.f32.mrb[3].mxu0 }
 0x23f   :  { %168 = vst.msk [vmem:[#allocation7] sm:$0xff] %vm52_vm0, %v166_v39  ;;  %v167_v42 = vadd.f32 %v163_v40, %v51_v1 }
 0x241   :  { %169 = vst.msk [vmem:[#allocation7 + $0x8] sm:$0xff] %vm52_vm0, %v167_v42 }
 0x242   :  { %275 = shalt.err (!%p272_p6)
}
 0x243   :  { %s276_s27 = scalar_lea.hbm %s394_s5, 256 }
 0x244   :  { %p277_p7 = scmp.ne.s32.totalorder %s394_s5, %s276_s27  ;;  %p280_p8 = scmp.lt.u32.totalorder %s276_s27, %s394_s5 }
 0x246   :  { %p282_p9 = pnand %p280_p8, %p277_p7 }
 0x248   :  { %285 = shalt.err (!%p282_p9)
}
 0x249   :  { %181 = dma.vmem_to_hbm [thread:$0]  %s176_s25, 256, %s394_s5, [#allocation4], %s293_s28, %s293_s28, %s294_s29  }
 0x24a   :  { %290 = dma.done.wait [#allocation4], 256  }
 0x24b   :  { %291 = vsyncadd [#allocation4], 4294967040 }
 0x24c   :  { %185 = vsyncpa [#allocation3], 1 }
 0x24d   :  { %186 = vsyncpa [#allocation6], 1 }
 0x24e   :  { %187 = vsyncpa [#allocation4], 1 }

</bundles_post_ra>
